<compile_context>
chip_gen: v6e
topology: v6e:2x2x1
jax: 0.10.0
libtpu: 0.0.40
codegen_flags: <defaults>
</compile_context>

<pallas_src>
import functools

import jax
import jax.numpy as jnp
from jax import lax
from jax.experimental import pallas as pl
from jax.experimental.pallas import tpu as pltpu

# Deterministic "parameters": the fixed sobel kernel from get_sobel_kernel_2d().
SOBEL_2D = ((-1.0, 0.0, 1.0),
            (-2.0, 0.0, 2.0),
            (-1.0, 0.0, 1.0))


def _div2d_kernel(x_ref, o_ref, *, sx8, sy8):
    """x_ref: (Tb, 2, H, W) block; o_ref: (Tb, 1, H, W) block."""
    x = x_ref[...].astype(jnp.float32)          # single full-block load
    u = x[:, 0]                                  # (Tb, H, W) x-component
    v = x[:, 1]                                  # (Tb, H, W) y-component
    H, W = u.shape[-2], u.shape[-1]

    # --- du/dx: vertical [1,2,1] smooth (reflect rows), then horizontal
    #     [-1,0,1] central difference (reflect columns). ---------------------
    u_up = jnp.concatenate([u[:, 1:2, :], u[:, : H - 1, :]], axis=1)         # u[i-1]; row -1 -> 1
    u_dn = jnp.concatenate([u[:, 1:, :], u[:, H - 2 : H - 1, :]], axis=1)    # u[i+1]; row H  -> H-2
    su = u_up + 2.0 * u + u_dn
    su_l = jnp.concatenate([su[:, :, 1:2], su[:, :, : W - 1]], axis=2)       # su[j-1]; col -1 -> 1
    su_r = jnp.concatenate([su[:, :, 1:], su[:, :, W - 2 : W - 1]], axis=2)  # su[j+1]; col W  -> W-2
    dudx8 = su_r - su_l                                                      # 8 * du/dx

    # --- dv/dy: horizontal [1,2,1] smooth (reflect columns), then vertical
    #     [-1,0,1] central difference (reflect rows). ------------------------
    v_l = jnp.concatenate([v[:, :, 1:2], v[:, :, : W - 1]], axis=2)
    v_r = jnp.concatenate([v[:, :, 1:], v[:, :, W - 2 : W - 1]], axis=2)
    sv = v_l + 2.0 * v + v_r
    sv_u = jnp.concatenate([sv[:, 1:2, :], sv[:, : H - 1, :]], axis=1)
    sv_d = jnp.concatenate([sv[:, 1:, :], sv[:, H - 2 : H - 1, :]], axis=1)
    dvdy8 = sv_d - sv_u                                                      # 8 * dv/dy

    # Single full-tile, lane-dense output store.
    o_ref[:, 0] = (sx8 * dudx8 + sy8 * dvdy8).astype(o_ref.dtype)


def _pick_t_block(T, H, W, itemsize):
    """Batch T slices per grid step: ~4 MiB HBM work, VMEM-safe, >=2 steps."""
    per_t_hbm = 3 * H * W * itemsize                       # 2 in + 1 out per slice
    # double-buffered I/O blocks + f32 value temporaries (rough upper bound)
    per_t_vmem = 2 * (2 * H * W * itemsize) + 2 * (H * W * itemsize) + 8 * H * W * 4
    tb = max(1, (4 * 1024 * 1024) // max(per_t_hbm, 1))
    tb = min(tb, max(1, (24 * 1024 * 1024) // max(per_t_vmem, 1)))
    tb = min(tb, T)
    if T >= 2:
        tb = min(tb, max(1, T // 2))                       # >=2 grid steps for megacore
    while T % tb:                                          # avoid partial trailing blocks
        tb -= 1
    return tb


def field_divergence_2d(field, dx_convention="pixel"):
    """field: [T, H, W, 2] -> divergence [T, 1, H, W] (matches the PyTorch module)."""
    T, H, W, C = field.shape
    assert C == 2, "2D path expects field[..., 2]"
    assert H >= 2 and W >= 2, "reflect-padded 3x3 stencil needs H, W >= 2"

    if dx_convention == "square":
        scale_x, scale_y = float(W - 1), float(H - 1)
    elif dx_convention == "2square":
        scale_x, scale_y = float(W - 1) / 2.0, float(H - 1) / 2.0
    else:  # 'pixel'
        scale_x, scale_y = 1.0, 1.0

    # grid2im glue: [T,H,W,2] -> [T,2,H,W]; one contiguous, lane-dense input.
    x = jnp.moveaxis(field, -1, 1)

    itemsize = jnp.dtype(field.dtype).itemsize
    Tb = _pick_t_block(T, H, W, itemsize)
    grid = (T // Tb,)

    kernel = functools.partial(_div2d_kernel, sx8=scale_x / 8.0, sy8=scale_y / 8.0)
    cost = pl.CostEstimate(flops=12 * T * H * W, transcendentals=0,
                           bytes_accessed=3 * T * H * W * itemsize)

    out = pl.pallas_call(
        kernel,
        out_shape=jax.ShapeDtypeStruct((T, 1, H, W), field.dtype),
        grid_spec=pltpu.PrefetchScalarGridSpec(
            num_scalar_prefetch=0,
            grid=grid,
            in_specs=[pl.BlockSpec((Tb, 2, H, W), lambda t: (t, 0, 0, 0))],
            out_specs=pl.BlockSpec((Tb, 1, H, W), lambda t: (t, 0, 0, 0)),
        ),
        compiler_params=pltpu.CompilerParams(
            dimension_semantics=("parallel",),
            vmem_limit_bytes=32 * 1024 * 1024),
        cost_estimate=cost,
    )(x)
    return out  # [T, 1, H, W], matches torch.stack(...).sum(0)


def _reference(field, dx_convention="pixel"):
    """Pure-JAX reference (XLA conv = cross-correlation, like F.conv2d)."""
    T, H, W, _ = field.shape
    kx = jnp.array(SOBEL_2D, jnp.float32) / 8.0
    ky = kx.T
    u = field[..., 0][:, None]  # [T,1,H,W]
    v = field[..., 1][:, None]
    u_pad = jnp.pad(u, ((0, 0), (0, 0), (1, 1), (1, 1)), mode="reflect")
    v_pad = jnp.pad(v, ((0, 0), (0, 0), (1, 1), (1, 1)), mode="reflect")
    dudx = lax.conv_general_dilated(u_pad, kx[None, None], (1, 1), "VALID")
    dvdy = lax.conv_general_dilated(v_pad, ky[None, None], (1, 1), "VALID")
    if dx_convention == "square":
        sx, sy = float(W - 1), float(H - 1)
    elif dx_convention == "2square":
        sx, sy = float(W - 1) / 2.0, float(H - 1) / 2.0
    else:
        sx, sy = 1.0, 1.0
    return sx * dudx + sy * dvdy


if __name__ == "__main__":
    key = jax.random.PRNGKey(0)
    T, H, W = 4, 16, 128
    field = jax.random.normal(key, (T, H, W, 2), dtype=jnp.float32)

    for conv in ("pixel", "square", "2square"):
        out = jax.block_until_ready(field_divergence_2d(field, dx_convention=conv))
        ref = _reference(field, dx_convention=conv)
        assert out.shape == (T, 1, H, W), out.shape
        assert jnp.allclose(out, ref, atol=1e-3, rtol=1e-4), f"mismatch vs reference ({conv})"

    print("KERNEL_OK")
</pallas_src>

<mosaic_0001>
module attributes {stable_mosaic.version = 11 : i64} {
  func.func @_div2d_kernel(%arg0: i32, %arg1: memref<2x2x16x128xf32, #tpu.memory_space<vmem>>, %arg2: memref<2x1x16x128xf32, #tpu.memory_space<vmem>>) attributes {dimension_semantics = [#tpu.dimension_semantics<parallel>], iteration_bounds = array<i64: 2>, scalar_prefetch = 0 : i64, scratch_operands = 0 : i64, tpu.core_type = #tpu.core_type<tc>, window_params = [{transform_indices = @transform_0, window_bounds = array<i64: 2, 2, 16, 128>}, {transform_indices = @transform_1, window_bounds = array<i64: 2, 1, 16, 128>}]} {
    %c0 = arith.constant 0 : index
    %c0_0 = arith.constant 0 : index
    %c0_1 = arith.constant 0 : index
    %c0_2 = arith.constant 0 : index
    %0 = vector.load %arg1[%c0, %c0_0, %c0_1, %c0_2] : memref<2x2x16x128xf32, #tpu.memory_space<vmem>>, vector<2x2x16x128xf32>
    %1 = vector.extract_strided_slice %0 {offsets = [0, 0, 0, 0], sizes = [2, 1, 16, 128], strides = [1, 1, 1, 1]} : vector<2x2x16x128xf32> to vector<2x1x16x128xf32>
    %2 = vector.shape_cast %1 : vector<2x1x16x128xf32> to vector<2x16x128xf32>
    %3 = vector.extract_strided_slice %0 {offsets = [0, 1, 0, 0], sizes = [2, 1, 16, 128], strides = [1, 1, 1, 1]} : vector<2x2x16x128xf32> to vector<2x1x16x128xf32>
    %4 = vector.shape_cast %3 : vector<2x1x16x128xf32> to vector<2x16x128xf32>
    %5 = vector.extract_strided_slice %2 {offsets = [0, 1, 0], sizes = [2, 1, 128], strides = [1, 1, 1]} : vector<2x16x128xf32> to vector<2x1x128xf32>
    %6 = vector.extract_strided_slice %2 {offsets = [0, 0, 0], sizes = [2, 15, 128], strides = [1, 1, 1]} : vector<2x16x128xf32> to vector<2x15x128xf32>
    %7 = tpu.concatenate %5, %6 in 1 : vector<2x1x128xf32>, vector<2x15x128xf32> -> vector<2x16x128xf32>
    %8 = vector.extract_strided_slice %2 {offsets = [0, 1, 0], sizes = [2, 15, 128], strides = [1, 1, 1]} : vector<2x16x128xf32> to vector<2x15x128xf32>
    %9 = vector.extract_strided_slice %2 {offsets = [0, 14, 0], sizes = [2, 1, 128], strides = [1, 1, 1]} : vector<2x16x128xf32> to vector<2x1x128xf32>
    %10 = tpu.concatenate %8, %9 in 1 : vector<2x15x128xf32>, vector<2x1x128xf32> -> vector<2x16x128xf32>
    %cst = arith.constant 2.000000e+00 : f32
    %11 = vector.broadcast %cst : f32 to vector<2x16x128xf32>
    %12 = arith.mulf %11, %2 : vector<2x16x128xf32>
    %13 = arith.addf %7, %12 : vector<2x16x128xf32>
    %14 = arith.addf %13, %10 : vector<2x16x128xf32>
    %15 = vector.extract_strided_slice %14 {offsets = [0, 0, 1], sizes = [2, 16, 1], strides = [1, 1, 1]} : vector<2x16x128xf32> to vector<2x16x1xf32>
    %16 = vector.extract_strided_slice %14 {offsets = [0, 0, 0], sizes = [2, 16, 127], strides = [1, 1, 1]} : vector<2x16x128xf32> to vector<2x16x127xf32>
    %17 = tpu.concatenate %15, %16 in 2 : vector<2x16x1xf32>, vector<2x16x127xf32> -> vector<2x16x128xf32>
    %18 = vector.extract_strided_slice %14 {offsets = [0, 0, 1], sizes = [2, 16, 127], strides = [1, 1, 1]} : vector<2x16x128xf32> to vector<2x16x127xf32>
    %19 = vector.extract_strided_slice %14 {offsets = [0, 0, 126], sizes = [2, 16, 1], strides = [1, 1, 1]} : vector<2x16x128xf32> to vector<2x16x1xf32>
    %20 = tpu.concatenate %18, %19 in 2 : vector<2x16x127xf32>, vector<2x16x1xf32> -> vector<2x16x128xf32>
    %21 = arith.subf %20, %17 : vector<2x16x128xf32>
    %22 = vector.extract_strided_slice %4 {offsets = [0, 0, 1], sizes = [2, 16, 1], strides = [1, 1, 1]} : vector<2x16x128xf32> to vector<2x16x1xf32>
    %23 = vector.extract_strided_slice %4 {offsets = [0, 0, 0], sizes = [2, 16, 127], strides = [1, 1, 1]} : vector<2x16x128xf32> to vector<2x16x127xf32>
    %24 = tpu.concatenate %22, %23 in 2 : vector<2x16x1xf32>, vector<2x16x127xf32> -> vector<2x16x128xf32>
    %25 = vector.extract_strided_slice %4 {offsets = [0, 0, 1], sizes = [2, 16, 127], strides = [1, 1, 1]} : vector<2x16x128xf32> to vector<2x16x127xf32>
    %26 = vector.extract_strided_slice %4 {offsets = [0, 0, 126], sizes = [2, 16, 1], strides = [1, 1, 1]} : vector<2x16x128xf32> to vector<2x16x1xf32>
    %27 = tpu.concatenate %25, %26 in 2 : vector<2x16x127xf32>, vector<2x16x1xf32> -> vector<2x16x128xf32>
    %cst_3 = arith.constant 2.000000e+00 : f32
    %28 = vector.broadcast %cst_3 : f32 to vector<2x16x128xf32>
    %29 = arith.mulf %28, %4 : vector<2x16x128xf32>
    %30 = arith.addf %24, %29 : vector<2x16x128xf32>
    %31 = arith.addf %30, %27 : vector<2x16x128xf32>
    %32 = vector.extract_strided_slice %31 {offsets = [0, 1, 0], sizes = [2, 1, 128], strides = [1, 1, 1]} : vector<2x16x128xf32> to vector<2x1x128xf32>
    %33 = vector.extract_strided_slice %31 {offsets = [0, 0, 0], sizes = [2, 15, 128], strides = [1, 1, 1]} : vector<2x16x128xf32> to vector<2x15x128xf32>
    %34 = tpu.concatenate %32, %33 in 1 : vector<2x1x128xf32>, vector<2x15x128xf32> -> vector<2x16x128xf32>
    %35 = vector.extract_strided_slice %31 {offsets = [0, 1, 0], sizes = [2, 15, 128], strides = [1, 1, 1]} : vector<2x16x128xf32> to vector<2x15x128xf32>
    %36 = vector.extract_strided_slice %31 {offsets = [0, 14, 0], sizes = [2, 1, 128], strides = [1, 1, 1]} : vector<2x16x128xf32> to vector<2x1x128xf32>
    %37 = tpu.concatenate %35, %36 in 1 : vector<2x15x128xf32>, vector<2x1x128xf32> -> vector<2x16x128xf32>
    %38 = arith.subf %37, %34 : vector<2x16x128xf32>
    %cst_4 = arith.constant 1.250000e-01 : f32
    %39 = vector.broadcast %cst_4 : f32 to vector<2x16x128xf32>
    %40 = arith.mulf %39, %21 : vector<2x16x128xf32>
    %cst_5 = arith.constant 1.250000e-01 : f32
    %41 = vector.broadcast %cst_5 : f32 to vector<2x16x128xf32>
    %42 = arith.mulf %41, %38 : vector<2x16x128xf32>
    %43 = arith.addf %40, %42 : vector<2x16x128xf32>
    %c0_6 = arith.constant 0 : index
    %c0_7 = arith.constant 0 : index
    %c0_8 = arith.constant 0 : index
    %c0_9 = arith.constant 0 : index
    %44 = vector.load %arg2[%c0_6, %c0_7, %c0_8, %c0_9] : memref<2x1x16x128xf32, #tpu.memory_space<vmem>>, vector<2x1x16x128xf32>
    %45 = vector.shape_cast %44 : vector<2x1x16x128xf32> to vector<2x16x128xf32>
    %46 = vector.shape_cast %43 : vector<2x16x128xf32> to vector<2x1x16x128xf32>
    tpu.vector_store %arg2[%c0_6, %c0_7, %c0_8, %c0_9], %46 {strides = array<i32>} : memref<2x1x16x128xf32, #tpu.memory_space<vmem>>, vector<2x1x16x128xf32>,
    return
  }
  func.func @transform_0(%arg0: i32) -> (i32, i32, i32, i32) {
    %c0_i32 = arith.constant 0 : i32
    %c0_i32_0 = arith.constant 0 : i32
    %c0_i32_1 = arith.constant 0 : i32
    %c0_i32_2 = arith.constant 0 : i32
    return %arg0, %c0_i32, %c0_i32_0, %c0_i32_1 : i32, i32, i32, i32
  }
  func.func @transform_1(%arg0: i32) -> (i32, i32, i32, i32) {
    %c0_i32 = arith.constant 0 : i32
    %c0_i32_0 = arith.constant 0 : i32
    %c0_i32_1 = arith.constant 0 : i32
    %c0_i32_2 = arith.constant 0 : i32
    return %arg0, %c0_i32, %c0_i32_0, %c0_i32_1 : i32, i32, i32, i32
  }
}

</mosaic_0001>

<bundles_post_ra>
// kernel: tpu_custom_call.1
= control target key start
LH: loop header
LB: loop body
LE: loop exit
PB: predicated region body
PF: predicated region fallthrough
CT: control target
= control target key end

     0   :  { %6 = vsyncpa [#allocation3], 0  ;;  %s811_s0 = inlined_call_operand.hbm [shape: f32[4,2,16,128], index: 0, kind: input, shape index: {}]   ;;  %s812_s1 = inlined_call_operand.hbm [shape: f32[4,1,16,128], index: 1, kind: output, shape index: {}]  }
   0x1   :  { %8 = vsyncpa [#allocation3 + $0x1], 0 }
   0x2   :  { %9 = vsyncpa [#allocation4], 0 }
   0x3   :  { %11 = vsyncpa [#allocation4 + $0x1], 0  ;;  %s606_s6 = smov 0   ;;  %s608_s7 = smov 0  }
   0x4   :  { %s610_s8 = smov 0   ;;  %s612_s9 = smov 0  }
   0x5 LB: > { %s627_s10 = sadd.s32 4294967295, %s586_s9   ;;  %s422_s11 = sadd.s32 4294967294, %s586_s9   ;;  %s586_s9 = sphi %s612_s9, %s827_s9   ;;  %s582_s8 = sphi %s610_s8, %s826_s8   ;;  %s578_s7 = sphi %s608_s7, %s825_s7   ;;  %s574_s6 = sphi %s606_s6, %s824_s6  }
   0x6   : > { %s631_s12 = sadd.s32 1, %s586_s9   ;;  %s24_s13 = sadd.s32 1, %s582_s8 }
   0x7   : > { %s21_s14 = ssub.s32 %s586_s9, %s631_s12  ;;  %p31_p0 = scmp.ne.s32.totalorder %s582_s8, %s578_s7 }
   0x8   : > { %p22_p1 = scmp.eq.s32.totalorder %s21_s14, 0  ;;  %p32_p2 = scmp.eq.s32.totalorder %s586_s9, 0 }
   0x9   : > { %p37_p3 = scmp.ne.s32.totalorder %s578_s7, %s574_s6  ;;  %p38_p4 = scmp.eq.s32.totalorder %s627_s10, 0 }
   0xa   : > { %s643_s15 = scalar_select %p22_p1, %s582_s8, %s24_s13  }
   0xb   : > { %p645_p5 = por %p32_p2, %p31_p0  ;;  %p649_p6 = por %p38_p4, %p37_p3 }
   0xc   : > { %p61_p7 = scmp.eq.s32.totalorder %s627_s10, 1  ;;  %p67_p8 = scmp.eq.s32.totalorder %s422_s11, 1 }
   0xd   : > { %s816_s17 = scalar_select %p649_p6, 1, 0 }
   0xe   : > { %p454_p10 = scmp.lt.s32.totalorder %s586_s9, 2  ;;  %p656_p11 = por %p61_p7, %p31_p0 }
   0xf   : > { %p660_p12 = por %p67_p8, %p37_p3  ;;  %s87_s20 = sand.u32 1, %s582_s8  }
  0x10   : > { %s817_s18 = scalar_select %p656_p11, 1, 0 }
  0x11   : > { %s818_s19 = scalar_select %p660_p12, 1, 0 }
  0x12   : > { %s439_s21 = sshll.u32 %s586_s9, 10  ;;  %s425_s22 = sshll.u32 %s87_s20, 6 }
  0x13   : > { %s669_s25 = scalar_lea.hbm %s811_s0, %s439_s21  ;;  %s91_s26 = scalar_lea.vmem [#allocation2], %s425_s22 }
  0x14   : > { %s99_s27 = sshll.u32 %s91_s26, 4  ;;  %p673_p13 = pnand %p454_p10, %p645_p5  ;;  %s677_s27 = int_to_ptr.vmem [resolvable:$true] %s99_s27 }
  0x15   : > { %s679_s29 = scalar_lea.sflag [#allocation3], %s87_s20  ;;  %s494_s30 = scalar_lea.hbm %s669_s25, 1024 }
  0x16   : > { %p495_p0 = scmp.ne.s32.totalorder %s669_s25, %s494_s30  ;;  %p496_p1 = pneg %p673_p13 }
  0x17   : > { %s499_s4 = scalar_lea.hbm %s811_s0, 2048  ;;  %p500_p4 = scmp.lt.s32.totalorder %s669_s25, %s811_s0 }
  0x18   : > { %p497_p2 = pnand %p496_p1, %p495_p0  ;;  %p501_p5 = scmp.lt.s32.totalorder %s499_s4, %s494_s30 }
  0x1a   : > { %p498_p3 = pneg %p497_p2  ;;  %p502_p7 = por %p501_p5, %p500_p4 }
  0x1c   : > { %p503_p8 = pnand %p502_p7, %p498_p3 }
  0x1e   : > { %506 = shalt.err (!%p503_p8)
}
  0x1f   : > { %s507_s13 = scalar_lea.vmem %s677_s27, 1024  ;;  %s588_s14 = smov [#allocation2]  }
  0x20   : > { %p508_p10 = scmp.ne.s32.totalorder %s677_s27, %s507_s13  ;;  %s512_s16 = sshll.u32 %s588_s14, 4  ;;  %s513_s16 = int_to_ptr.vmem [resolvable:$false] %s512_s16 }
  0x21   : > { %s514_s20 = scalar_lea.vmem %s513_s16, 2048  ;;  %p515_p2 = scmp.lt.s32.totalorder %s677_s27, %s513_s16 }
  0x22   : > { %p510_p9 = pnand %p508_p10, %p496_p1  ;;  %p516_p12 = scmp.lt.s32.totalorder %s514_s20, %s507_s13 }
  0x24   : > { %p511_p0 = pneg %p510_p9  ;;  %p517_p11 = por %p516_p12, %p515_p2 }
  0x26   : > { %p518_p6 = pnand %p517_p11, %p511_p0 }
  0x28   : > { %521 = shalt.err (!%p518_p6)
}
  0x29   : > { %s589_s21 = smov 128   ;;  %s590_s22 = smov 8  }
  0x2a   : > { %449 = dma.hbm_to_vmem [thread:$0]  (!%p673_p13), %s669_s25, 1024, %s677_s27, %s679_s29, %s589_s21, %s589_s21, %s590_s22  }
  0x2b   : > { %p429_p9 = scmp.ge.s32.totalorder %s586_s9, 1  ;;  %p107_p1 = scmp.lt.s32.totalorder %s586_s9, 3 }
  0x2d   : > { %p108_p3 = pnand %p429_p9, %p107_p1 }
  0x2e   : > { %s703_s23 = sand.u32 (!%p108_p3), 1, %s578_s7   ;;  %p820_p6 = scmp.ne.s32.totalorder (!%p108_p3), %s816_s17, 0 }
  0x2f   : > { %111 = sbr.rel (%p108_p3) target bundleno = 219 (0xdb), region = 24  ;;  %s430_s24 = sshll.u32 (!%p108_p3), %s703_s23, 6 }
  0x30   : > { %s114_s26 = scalar_lea.sflag (!%p108_p3), [#allocation3], %s703_s23  ;;  %s117_s30 = scalar_lea.vmem (!%p108_p3), [#allocation2], %s430_s24 }
  0x34   : > { %565 = dma.done.wait (%p820_p6), %s114_s26, 1024  }
  0x35   : > { %567 = vsyncadd (%p820_p6), %s114_s26, 4294966272  ;;  %v711_v0 = vld [vmem:[%s117_s30 + $0x30] sm:$0xff]  ;;  %s591_s25 = smov 127   ;;  %v716_v2 = vld [vmem:[%s117_s30 + $0x38] sm:$0xff]  ;;  %vm154_vm0 = vcmask 1040384   ;;  %vm167_vm1 = vcmask 1046528  }
  0x36   : > { %v140_v1 = vld [vmem:[%s117_s30 + $0x10] sm:$0xff]  ;;  %242 = vrot.lane.b32.xlu1 %v711_v0, %s591_s25  ;;  %v138_v3 = vld [vmem:[%s117_s30] sm:$0xff]  ;;  %v141_v4 = vld [vmem:[%s117_s30 + $0x18] sm:$0xff]  ;;  %s592_s17 = smov 1   ;;  %vm220_vm2 = vcmask 7168   ;;  %vm225_vm3 = vcmask 1039360  }
  0x37   : > { %238 = vrot.lane.b32.xlu0 %v140_v1, %s591_s25  ;;  %v139_v5 = vld [vmem:[%s117_s30 + $0x8] sm:$0xff]  ;;  %v155_v6 = vrot.slane %v138_v3, 7  ;;  %v148_v7 = vrot.slane %v138_v3, 1  ;;  %v142_v8 = vld [vmem:[%s117_s30 + $0x20] sm:$0xff]  ;;  %v180_v12 = vmul.f32 2.0, %v138_v3  ;;  %v270_v40 = vmul.f32 2.0, %v140_v1 }
  0x38   : > { %v156_v9 = vrot.slane %v139_v5, 7  ;;  %v143_v10 = vld [vmem:[%s117_s30 + $0x28] sm:$0xff]  ;;  %v181_v11 = vmul.f32 2.0, %v139_v5  ;;  %v158_v13 = vrot.slane %v142_v8, 7  ;;  %v168_v16 = vrot.slane %v139_v5, 1  ;;  %s431_s27 = sshll.u32 %s703_s23, 5 }
  0x39   : > { %v159_v14 = vrot.slane %v143_v10, 7  ;;  %v165_v17 = vsel %vm154_vm0, %v148_v7, %v155_v6  ;;  %v149_v18 = vrot.slane %v142_v8, 1  ;;  %v183_v19 = vmul.f32 2.0, %v143_v10  ;;  %s135_s28 = scalar_lea.vmem [#allocation5], %s431_s27  ;;  %s441_s2 = sshll.u32 %s627_s10, 9 }
  0x3a   : > { %244 = vrot.lane.b32.xlu1 %v716_v2, %s591_s25  ;;  %v157_v15 = vsel %vm154_vm0, %v155_v6, %v156_v9  ;;  %v184_v21 = vadd.f32 %v180_v12, %v165_v17  ;;  %v182_v23 = vmul.f32 2.0, %v142_v8  ;;  %v178_v24 = vsel %vm167_vm1, %v168_v16, %v156_v9  ;;  %s349_s29 = sshll.u32 %s135_s28, 4  ;;  %s768_s5 = scalar_lea.hbm %s812_s1, %s441_s2  ;;  %s763_s29 = int_to_ptr.vmem [resolvable:$true] %s349_s29 }
  0x3b   : > { %240 = vrot.lane.b32.xlu0 %v141_v4, %s591_s25  ;;  %v185_v20 = vadd.f32 %v181_v11, %v157_v15  ;;  %v160_v22 = vsel %vm154_vm0, %v158_v13, %v159_v14  ;;  %v169_v25 = vsel %vm167_vm1, %v148_v7, %v168_v16  ;;  %v170_v26 = vrot.slane %v143_v10, 1  ;;  %s335_s10 = scalar_lea.sflag [#allocation4], %s703_s23  ;;  %s522_s11 = scalar_lea.vmem %s763_s29, 512 }
  0x3c   : > { %v166_v27 = vsel %vm154_vm0, %v149_v18, %v158_v13  ;;  %v187_v28 = vadd.f32 %v183_v19, %v160_v22  ;;  %v188_v30 = vadd.f32 %v184_v21, %v169_v25  ;;  %v271_v41 = vmul.f32 2.0, %v141_v4  ;;  %p523_p11 = scmp.ne.s32.totalorder %s763_s29, %s522_s11  ;;  %p821_p12 = scmp.ne.s32.totalorder %s817_s18, 0 }
  0x3d   : > { %v189_v29 = vadd.f32 %v185_v20, %v178_v24  ;;  %v186_v31 = vadd.f32 %v182_v23, %v166_v27  ;;  %v179_v32 = vsel %vm167_vm1, %v170_v26, %v159_v14  ;;  %v171_v33 = vsel %vm167_vm1, %v149_v18, %v170_v26  ;;  %s593_s13 = smov [#allocation5]  }
  0x3e   : > { %252 = vrot.lane.b32.xlu1 %v141_v4, %s592_s17  ;;  %v191_v34 = vadd.f32 %v187_v28, %v179_v32  ;;  %v272_v48 = vmul.f32 2.0, %v711_v0  ;;  %v273_v49 = vmul.f32 2.0, %v716_v2  ;;  %p524_p13 = pnand %p523_p11, %p821_p12  ;;  %s526_s14 = sshll.u32 %s593_s13, 4  ;;  %s527_s14 = int_to_ptr.vmem [resolvable:$false] %s526_s14 }
  0x3f   : > { %250 = vrot.lane.b32.xlu0 %v140_v1, %s592_s17  ;;  %v190_v35 = vadd.f32 %v186_v31, %v171_v33  ;;  %s528_s16 = scalar_lea.vmem %s527_s14, 1024  ;;  %p529_p5 = scmp.lt.s32.totalorder %s763_s29, %s527_s14 }
  0x40   : > { %p525_p4 = pneg %p524_p13  ;;  %p530_p7 = scmp.lt.s32.totalorder %s528_s16, %s522_s11 }
  0x42   : > { %256 = vrot.lane.b32.xlu1 %v716_v2, %s592_s17  ;;  %p531_p8 = por %p530_p7, %p529_p5 }
  0x43   : > { %254 = vrot.lane.b32.xlu0 %v711_v0, %s592_s17 }
  0x44   : > { %p532_p10 = pnand %p531_p8, %p525_p4 }
  0x46   : > { %198 = vrot.lane.b32.xlu1 %v189_v29, %s591_s25 }
  0x47   : > { %196 = vrot.lane.b32.xlu0 %v188_v30, %s591_s25 }
  0x4a   : > { %202 = vrot.lane.b32.xlu1 %v191_v34, %s591_s25 }
  0x4b   : > { %200 = vrot.lane.b32.xlu0 %v190_v35, %s591_s25 }
  0x4e   : > { %210 = vrot.lane.b32.xlu1 %v189_v29, %s592_s17 }
  0x4f   : > { %208 = vrot.lane.b32.xlu0 %v188_v30, %s592_s17 }
  0x52   : > { %214 = vrot.lane.b32.xlu1 %v191_v34, %s592_s17 }
  0x53   : > { %212 = vrot.lane.b32.xlu0 %v190_v35, %s592_s17 }
  0xa8   : > { %v243_v36 = vpop.permute.xlu1 %242 }
  0xa9   : > { %v239_v37 = vpop.permute.xlu0 %238 }
  0xac   : > { %v245_v38 = vpop.permute.xlu1 %244 }
  0xad   : > { %v241_v39 = vpop.permute.xlu0 %240 }
  0xb0   : > { %v253_v42 = vpop.permute.xlu1 %252 }
  0xb1   : > { %v251_v43 = vpop.permute.xlu0 %250  ;;  %v263_v44 = vsel %vm220_vm2, %v241_v39, %v253_v42  ;;  %v267_v50 = vsel %vm225_vm3, %v241_v39, %v253_v42 }
  0xb2   : > { %v262_v45 = vsel %vm220_vm2, %v239_v37, %v251_v43  ;;  %v275_v46 = vadd.f32 %v271_v41, %v263_v44  ;;  %v266_v51 = vsel %vm225_vm3, %v239_v37, %v251_v43 }
  0xb3   : > { %v274_v47 = vadd.f32 %v270_v40, %v262_v45 }
  0xb4   : > { %v279_v52 = vadd.f32 %v275_v46, %v267_v50  ;;  %v257_v54 = vpop.permute.xlu1 %256 }
  0xb5   : > { %v278_v53 = vadd.f32 %v274_v47, %v266_v51  ;;  %v255_v55 = vpop.permute.xlu0 %254  ;;  %v265_v56 = vsel %vm220_vm2, %v245_v38, %v257_v54  ;;  %v269_v62 = vsel %vm225_vm3, %v245_v38, %v257_v54 }
  0xb6   : > { %v264_v57 = vsel %vm220_vm2, %v243_v36, %v255_v55  ;;  %v291_v58 = vrot.slane %v279_v52, 7  ;;  %v302_v59 = vrot.slane %v279_v52, 1  ;;  %v277_v63 = vadd.f32 %v273_v49, %v265_v56 }
  0xb7   : > { %v284_v60 = vrot.slane %v278_v53, 1  ;;  %v290_v61 = vrot.slane %v278_v53, 7  ;;  %v268_v0 = vsel %vm225_vm3, %v243_v36, %v255_v55  ;;  %v276_v1 = vadd.f32 %v272_v48, %v264_v57 }
  0xb8   : > { %v199_v2 = vpop.permute.xlu1 %198  ;;  %v312_v5 = vsel %vm167_vm1, %v302_v59, %v291_v58  ;;  %v281_v8 = vadd.f32 %v277_v63, %v269_v62 }
  0xb9   : > { %v197_v3 = vpop.permute.xlu0 %196  ;;  %v292_v4 = vsel %vm154_vm0, %v290_v61, %v291_v58  ;;  %v300_v6 = vsel %vm154_vm0, %v284_v60, %v290_v61  ;;  %v303_v7 = vsel %vm167_vm1, %v284_v60, %v302_v59  ;;  %v280_v9 = vadd.f32 %v276_v1, %v268_v0 }
  0xba   : > { %v315_v10 = vsub.f32 %v312_v5, %v292_v4  ;;  %v314_v11 = vsub.f32 %v303_v7, %v300_v6  ;;  %v294_v12 = vrot.slane %v281_v8, 7  ;;  %v304_v13 = vrot.slane %v281_v8, 1 }
  0xbb   : > { %v285_v14 = vrot.slane %v280_v9, 1  ;;  %v293_v15 = vrot.slane %v280_v9, 7 }
  0xbc   : > { %v203_v16 = vpop.permute.xlu1 %202  ;;  %v313_v19 = vsel %vm167_vm1, %v304_v13, %v294_v12  ;;  %v323_v32 = vmul.f32 0.125, %v315_v10  ;;  %v322_v34 = vmul.f32 0.125, %v314_v11 }
  0xbd   : > { %v201_v17 = vpop.permute.xlu0 %200  ;;  %v295_v18 = vsel %vm154_vm0, %v293_v15, %v294_v12  ;;  %v301_v20 = vsel %vm154_vm0, %v285_v14, %v293_v15  ;;  %v305_v21 = vsel %vm167_vm1, %v285_v14, %v304_v13 }
  0xbe   : > { %v317_v22 = vsub.f32 %v313_v19, %v295_v18  ;;  %v316_v23 = vsub.f32 %v305_v21, %v301_v20 }
  0xc0   : > { %v211_v24 = vpop.permute.xlu1 %210  ;;  %v325_v46 = vmul.f32 0.125, %v317_v22  ;;  %v324_v48 = vmul.f32 0.125, %v316_v23 }
  0xc1   : > { %v209_v25 = vpop.permute.xlu0 %208  ;;  %v222_v26 = vsel %vm220_vm2, %v199_v2, %v211_v24  ;;  %v227_v27 = vsel %vm225_vm3, %v199_v2, %v211_v24 }
  0xc2   : > { %v221_v28 = vsel %vm220_vm2, %v197_v3, %v209_v25  ;;  %v226_v29 = vsel %vm225_vm3, %v197_v3, %v209_v25  ;;  %v231_v30 = vsub.f32 %v227_v27, %v222_v26 }
  0xc3   : > { %v230_v31 = vsub.f32 %v226_v29, %v221_v28 }
  0xc4   : > { %v319_v33 = vmul.f32 0.125, %v231_v30  ;;  %v215_v36 = vpop.permute.xlu1 %214 }
  0xc5   : > { %v318_v35 = vmul.f32 0.125, %v230_v31  ;;  %v213_v37 = vpop.permute.xlu0 %212  ;;  %v224_v38 = vsel %vm220_vm2, %v203_v16, %v215_v36  ;;  %v229_v39 = vsel %vm225_vm3, %v203_v16, %v215_v36 }
  0xc6   : > { %v223_v40 = vsel %vm220_vm2, %v201_v17, %v213_v37  ;;  %v228_v41 = vsel %vm225_vm3, %v201_v17, %v213_v37  ;;  %v327_v42 = vadd.f32 %v323_v32, %v319_v33  ;;  %v233_v44 = vsub.f32 %v229_v39, %v224_v38 }
  0xc7   : > { %v326_v43 = vadd.f32 %v322_v34, %v318_v35  ;;  %v232_v45 = vsub.f32 %v228_v41, %v223_v40 }
  0xc8   : > { %331 = vst [vmem:[%s135_s28 + $0x8] sm:$0xff] %v327_v42  ;;  %v321_v47 = vmul.f32 0.125, %v233_v44 }
  0xc9   : > { %330 = vst [vmem:[%s135_s28] sm:$0xff] %v326_v43  ;;  %v320_v49 = vmul.f32 0.125, %v232_v45 }
  0xca   : > { %v329_v50 = vadd.f32 %v325_v46, %v321_v47 }
  0xcb   : > { %v328_v51 = vadd.f32 %v324_v48, %v320_v49 }
  0xcc   : > { %333 = vst [vmem:[%s135_s28 + $0x18] sm:$0xff] %v329_v50 }
  0xcd   : > { %332 = vst [vmem:[%s135_s28 + $0x10] sm:$0xff] %v328_v51 }
  0xce   : > { %535 = shalt.err (!%p532_p10)
}
  0xcf   : > { %s536_s20 = scalar_lea.hbm %s768_s5, 512  ;;  %s540_s24 = scalar_lea.hbm %s812_s1, 1024 }
  0xd0   : > { %p537_p0 = scmp.ne.s32.totalorder %s768_s5, %s536_s20  ;;  %p541_p1 = scmp.lt.s32.totalorder %s768_s5, %s812_s1 }
  0xd1   : > { %p542_p3 = scmp.lt.s32.totalorder %s540_s24, %s536_s20 }
  0xd2   : > { %p538_p2 = pnand %p537_p0, %p821_p12 }
  0xd3   : > { %p543_p6 = por %p542_p3, %p541_p1 }
  0xd4   : > { %p539_p9 = pneg %p538_p2 }
  0xd6   : > { %p544_p11 = pnand %p543_p6, %p539_p9 }
  0xd8   : > { %547 = shalt.err (!%p544_p11)
}
  0xd9   : > { %s594_s25 = smov 128   ;;  %s595_s17 = smov 8  }
  0xda   : > { %444 = dma.vmem_to_hbm [thread:$0]  (%p821_p12), %s763_s29, 512, %s768_s5, %s335_s10, %s594_s25, %s594_s25, %s595_s17  }
  0xdb PF: > { %s364_s27 = sand.u32 1, %s574_s6   ;;  %p822_p13 = scmp.ne.s32.totalorder %s818_s19, 0 }
  0xdc   : > { %p823_p4 = scmp.ge.s32.totalorder %s586_s9, 2  ;;  %s365_s28 = scalar_lea.sflag [#allocation4], %s364_s27 }
  0xde   : > { %p451_p5 = pnand %p823_p4, %p822_p13 }
  0xe0   : > { %p452_p7 = pneg %p451_p5 }
  0xe2   : > { %569 = dma.done.wait (%p452_p7), %s365_s28, 512  }
  0xe3   : > { %571 = vsyncadd (%p452_p7), %s365_s28, 4294966784  ;;  %p14_p8 = scmp.ge.s32.totalorder %s631_s12, 4   ;;  %s824_s6 = smov %s578_s7 }
  0xe4   : > { %s825_s7 = smov %s582_s8  ;;  %s826_s8 = smov %s643_s15 }
  0xe5   : > { %s827_s9 = smov %s631_s12  ;;  %16 = sbr.rel (!%p14_p8) target bundleno = 5 (0x5), region = 69 }
  0xea   :  { %370 = vsyncpa [#allocation3], 1 }
  0xeb   :  { %372 = vsyncpa [#allocation3 + $0x1], 1 }
  0xec   :  { %373 = vsyncpa [#allocation4], 1 }
  0xed   :  { %375 = vsyncpa [#allocation4 + $0x1], 1 }

</bundles_post_ra>
